<compile_context>
chip_gen: v7x
topology: tpu7x:2x2x1
jax: 0.10.0
libtpu: 0.0.40
codegen_flags: <defaults>
</compile_context>

<pallas_src>
import functools

import jax
import jax.numpy as jnp
from jax.experimental import pallas as pl
from jax.experimental.pallas import tpu as pltpu

_MIB = 1024 * 1024


def _round_up(a: int, b: int) -> int:
    return ((a + b - 1) // b) * b


def _pick_tile(dim: int, want: int, align: int) -> int:
    """Largest `align`-multiple tile <= want that evenly divides dim.
    Falls back to the full dimension (always a legal block size)."""
    if dim <= want:
        return dim
    t = (min(want, dim) // align) * align
    while t >= align:
        if dim % t == 0:
            return t
        t -= align
    return dim


def _tpu_generation() -> str:
    """Best-effort TPU generation detection: 'v5e' | 'v6e' | 'v7x'."""
    try:
        kind = jax.devices()[0].device_kind.lower()
    except Exception:
        kind = ""
    if "7" in kind:
        return "v7x"
    if "v5 lite" in kind or "v5e" in kind or "v5lite" in kind:
        return "v5e"
    return "v6e"  # safe default for v6e-class (and other 128 MiB VMEM chips)


def _gen_defaults(gen: str):
    """(tm, tn, tk, vmem_limit_bytes) sized per generation."""
    if gen == "v5e":
        # Compute-bound at ~512x512 already; larger tiles only add epilogue
        # and vreg pressure (1 vst slot, 4x128^2 MXU).
        return 512, 512, 512, 80 * _MIB
    if gen == "v7x":
        # 64 MiB VMEM per TC -> keep the scoped limit at 40 MiB with headroom.
        return 1024, 1024, 512, 40 * _MIB
    # v6e (918 TF/s bf16) wants a 1024-class output tile; 128 MiB VMEM.
    return 1024, 1024, 512, 96 * _MIB


def _vmem_estimate(tm_e, tn_e, tk_e, lhs_isz, w_isz, res_isz, out_isz):
    """Rough live-VMEM bytes: double-buffered inputs/outputs + f32 accumulator."""
    return (2 * tm_e * tk_e * lhs_isz       # x (MXU LHS)
            + 2 * tk_e * tn_e * w_isz       # weight
            + 2 * tn_e * 4                  # bias
            + 2 * tm_e * tn_e * res_isz     # residual
            + 2 * tm_e * tn_e * out_isz     # output
            + tm_e * tn_e * 4)              # f32 accumulator


def _residual_linear_kernel(x_ref, w_ref, b_ref, r_ref, o_ref, acc_ref):
    """One (i, j, k) grid step of out = x @ W + b + x.

    x_ref : (tm, tk)  LHS tile of x (MXU operand dtype)     block (i, k)
    w_ref : (tk, tn)  weight tile, (in, out) layout          block (k, j)
    b_ref : (1, tn)   bias tile (f32)                        block (0, j)
    r_ref : (tm, tn)  residual tile of x (original dtype)    block (i, j)
    o_ref : (tm, tn)  output tile                            block (i, j)
    acc_ref: (tm, tn) f32 scratch accumulator, persists across k.

    Bias + residual are folded into the accumulator INIT so the last-k
    epilogue is just a cast + store.
    """
    k = pl.program_id(2)

    @pl.when(k == 0)
    def _():
        acc_ref[...] = (r_ref[...].astype(jnp.float32)
                        + b_ref[...].astype(jnp.float32))

    acc_ref[...] += jnp.dot(
        x_ref[...], w_ref[...], preferred_element_type=jnp.float32
    )

    @pl.when(k == pl.num_programs(2) - 1)
    def _():
        o_ref[...] = acc_ref[...].astype(o_ref.dtype)


def make_residual_linear_params(weight, bias, mxu_dtype=jnp.bfloat16):
    """One-time parameter setup (outside the per-call hot path).

    weight : (out_features, in_features)  -- PyTorch nn.Linear layout.
    Returns (w_t, bias) with w_t transposed to (in, out) AND pre-cast to the
    MXU operand dtype, so neither the transpose nor the cast is redone per call.
    bf16 is the default on every generation (v7x's MXU has no f32 path);
    accumulation / bias / residual stay f32.
    """
    w_t = jnp.asarray(weight).T.astype(mxu_dtype)
    b = jnp.asarray(bias, dtype=jnp.float32)
    return w_t, b


@functools.partial(jax.jit, static_argnames=("tm", "tn", "tk"))
def residual_add_linear(x, w_t, bias, *, tm=None, tn=None, tk=None):
    """out = (x @ w_t + bias) + x, fused in a single Pallas kernel.

    x    : (..., D)  residual / output keep this dtype.
    w_t  : (D, D) weight in (in_features, out_features) layout, already in the
           MXU operand dtype (see make_residual_linear_params).
    bias : (D,) float32.
    tm/tn/tk : optional tile overrides; default is generation-sized.
    """
    D = x.shape[-1]
    assert w_t.shape == (D, D) and bias.shape == (D,)

    mxu_dtype = w_t.dtype
    orig_shape = x.shape
    M = 1
    for s in orig_shape[:-1]:
        M *= s
    x2d = x.reshape(M, D)

    # ---- generation-aware defaults ----------------------------------------
    gen = _tpu_generation()
    tm_d, tn_d, tk_d, vmem_limit = _gen_defaults(gen)
    tm = tm_d if tm is None else tm
    tn = tn_d if tn is None else tn
    tk = tk_d if tk is None else tk
    try:  # cap against physical VMEM as an extra safety net
        phys = pltpu.get_tpu_info().vmem_capacity_bytes
        vmem_limit = min(vmem_limit, int(0.7 * phys))
    except Exception:
        pass
    budget = int(0.8 * vmem_limit)

    lhs_isz = w_t.dtype.itemsize          # MXU operand bytes (x cast + weight)
    res_isz = x2d.dtype.itemsize
    out_isz = x.dtype.itemsize

    # ---- tile selection ----------------------------------------------------
    tn_e = _pick_tile(D, tn, 128)         # lane-dense (128-multiple) when D allows
    tk_e = _pick_tile(D, tk, 128)

    # Weight-resident path on 128-MiB chips: W and x each streamed exactly once.
    if gen != "v7x":
        if _vmem_estimate(tm, D, D, lhs_isz, lhs_isz, res_isz, out_isz) <= budget:
            tn_e = tk_e = D

    # Shrink tm if the chosen tiles would overflow the scoped-VMEM budget.
    tm_e = tm
    while (tm_e > 128 and
           _vmem_estimate(tm_e, tn_e, tk_e, lhs_isz, lhs_isz,
                          res_isz, out_isz) > budget):
        tm_e //= 2

    # Ragged / small M: pad to the MXU-operand sublane packing.
    sub_pack = {4: 8, 2: 16, 1: 32}.get(lhs_isz, 8)
    if M >= tm_e:
        Mp = _round_up(M, tm_e)
    else:
        Mp = _round_up(M, sub_pack)
        tm_e = Mp

    # Zero-pad ragged M: padded rows produce bias-only garbage sliced off below.
    if Mp != M:
        x2d = jnp.pad(x2d, ((0, Mp - M), (0, 0)))

    x_mm = x2d if x2d.dtype == mxu_dtype else x2d.astype(mxu_dtype)
    b2d = bias.reshape(1, D).astype(jnp.float32)

    grid = (Mp // tm_e, D // tn_e, D // tk_e)
    gi, gj, gk = grid

    # ---- cost estimate (now includes re-streaming factors) -----------------
    flops = 2 * Mp * D * D
    w_reads = gi if (gj > 1 or gk > 1) else 1   # constant block index => read once
    bytes_accessed = (Mp * D * lhs_isz * gj      # matmul LHS, re-read per j
                      + D * D * lhs_isz * w_reads
                      + Mp * D * res_isz         # residual, read once
                      + D * 4 * gi               # bias
                      + Mp * D * out_isz)        # output

    out2d = pl.pallas_call(
        _residual_linear_kernel,
        out_shape=jax.ShapeDtypeStruct((Mp, D), x.dtype),
        grid_spec=pltpu.PrefetchScalarGridSpec(
            num_scalar_prefetch=0,
            grid=grid,
            in_specs=[
                pl.BlockSpec((tm_e, tk_e), lambda i, j, k: (i, k)),  # x (MXU LHS)
                pl.BlockSpec((tk_e, tn_e), lambda i, j, k: (k, j)),  # weight
                pl.BlockSpec((1, tn_e),    lambda i, j, k: (0, j)),  # bias
                pl.BlockSpec((tm_e, tn_e), lambda i, j, k: (i, j)),  # x (residual)
            ],
            out_specs=pl.BlockSpec((tm_e, tn_e), lambda i, j, k: (i, j)),
            scratch_shapes=[pltpu.VMEM((tm_e, tn_e), jnp.float32)],
        ),
        compiler_params=pltpu.CompilerParams(
            # i/j parallel -> shards across the 2 TCs on v7x; k is the
            # reduction axis carried in the f32 accumulator.
            dimension_semantics=("parallel", "parallel", "arbitrary"),
            vmem_limit_bytes=vmem_limit,
        ),
        cost_estimate=pl.CostEstimate(
            flops=int(flops), transcendentals=0,
            bytes_accessed=int(bytes_accessed)),
    )(x_mm, w_t, b2d, x2d)

    return out2d[:M].reshape(orig_shape)


if __name__ == "__main__":
    # Small shapes consistent with a transformer-style residual block.
    B, S, D = 2, 8, 32

    key = jax.random.PRNGKey(0)
    kx, kw, kb = jax.random.split(key, 3)

    x = jax.random.normal(kx, (B, S, D), dtype=jnp.float32)
    # Deterministic parameters for the wrapped fn = Linear(D, D) in PyTorch's
    # (out_features, in_features) layout.
    weight = jax.random.normal(kw, (D, D), dtype=jnp.float32) * (1.0 / jnp.sqrt(D))
    bias = jax.random.normal(kb, (D,), dtype=jnp.float32) * 0.01

    # Reference (plain JAX) for ResidualAdd semantics: fn(x) + x
    ref = (x.reshape(-1, D) @ weight.T + bias).reshape(B, S, D) + x

    # f32-MXU path (exact check).
    w_t32, b32 = make_residual_linear_params(weight, bias, mxu_dtype=jnp.float32)
    out = jax.block_until_ready(residual_add_linear(x, w_t32, b32))
    assert jnp.allclose(out, ref, atol=1e-5, rtol=1e-5), "f32 mismatch vs reference"

    # bf16-MXU path — the throughput default on every generation (incl. v7x);
    # weight pre-cast once at setup, accumulation/bias/residual stay f32.
    w_t16, b16 = make_residual_linear_params(weight, bias)  # bf16 default
    out_bf16 = jax.block_until_ready(residual_add_linear(x, w_t16, b16))
    assert jnp.allclose(out_bf16, ref, atol=5e-2, rtol=5e-2), "bf16 mismatch vs reference"

    print("KERNEL_OK")
</pallas_src>

<mosaic_0001>
module attributes {stable_mosaic.version = 11 : i64} {
  func.func @_residual_linear_kernel(%arg0: i32, %arg1: i32, %arg2: i32, %arg3: memref<16x32xf32, #tpu.memory_space<vmem>>, %arg4: memref<32x32xf32, #tpu.memory_space<vmem>>, %arg5: memref<1x32xf32, #tpu.memory_space<vmem>>, %arg6: memref<16x32xf32, #tpu.memory_space<vmem>>, %arg7: memref<16x32xf32, #tpu.memory_space<vmem>>, %arg8: memref<16x32xf32, #tpu.memory_space<vmem>>) attributes {dimension_semantics = [#tpu.dimension_semantics<parallel>, #tpu.dimension_semantics<parallel>, #tpu.dimension_semantics<arbitrary>], iteration_bounds = array<i64: 1, 1, 1>, scalar_prefetch = 0 : i64, scratch_operands = 1 : i64, tpu.core_type = #tpu.core_type<tc>, window_params = [{transform_indices = @transform_0, window_bounds = array<i64: 16, 32>}, {transform_indices = @transform_1, window_bounds = array<i64: 32, 32>}, {transform_indices = @transform_2, window_bounds = array<i64: 1, 32>}, {transform_indices = @transform_3, window_bounds = array<i64: 16, 32>}, {transform_indices = @transform_4, window_bounds = array<i64: 16, 32>}]} {
    %c0_i32 = arith.constant 0 : i32
    %0 = arith.cmpi eq, %arg2, %c0_i32 : i32
    %1 = arith.extui %0 : i1 to i32
    %c0_i32_0 = arith.constant 0 : i32
    %2 = arith.cmpi ne, %1, %c0_i32_0 : i32
    scf.if %2 {
      %c0_10 = arith.constant 0 : index
      %c0_11 = arith.constant 0 : index
      %12 = vector.load %arg6[%c0_10, %c0_11] : memref<16x32xf32, #tpu.memory_space<vmem>>, vector<16x32xf32>
      %c0_12 = arith.constant 0 : index
      %c0_13 = arith.constant 0 : index
      %13 = vector.load %arg5[%c0_12, %c0_13] : memref<1x32xf32, #tpu.memory_space<vmem>>, vector<1x32xf32>
      %14 = vector.broadcast %13 : vector<1x32xf32> to vector<16x32xf32>
      %15 = arith.addf %12, %14 : vector<16x32xf32>
      %c0_14 = arith.constant 0 : index
      %c0_15 = arith.constant 0 : index
      %16 = vector.load %arg8[%c0_14, %c0_15] : memref<16x32xf32, #tpu.memory_space<vmem>>, vector<16x32xf32>
      tpu.vector_store %arg8[%c0_14, %c0_15], %15 {strides = array<i32>} : memref<16x32xf32, #tpu.memory_space<vmem>>, vector<16x32xf32>,
    } else {
    }
    %c0 = arith.constant 0 : index
    %c0_1 = arith.constant 0 : index
    %3 = vector.load %arg8[%c0, %c0_1] : memref<16x32xf32, #tpu.memory_space<vmem>>, vector<16x32xf32>
    %c0_2 = arith.constant 0 : index
    %c0_3 = arith.constant 0 : index
    %4 = vector.load %arg3[%c0_2, %c0_3] : memref<16x32xf32, #tpu.memory_space<vmem>>, vector<16x32xf32>
    %c0_4 = arith.constant 0 : index
    %c0_5 = arith.constant 0 : index
    %5 = vector.load %arg4[%c0_4, %c0_5] : memref<32x32xf32, #tpu.memory_space<vmem>>, vector<32x32xf32>
    %cst = arith.constant dense<0.000000e+00> : vector<16x32xf32>
    %6 = tpu.matmul %4, %5, %cst {dimension_numbers = #tpu.dot_dimension_numbers<[1], [0], [0], [1], [0, 0, 1, 1], [], []>} : vector<16x32xf32>, vector<32x32xf32>, vector<16x32xf32> -> vector<16x32xf32>
    %7 = arith.addf %3, %6 : vector<16x32xf32>
    %c0_6 = arith.constant 0 : index
    %c0_7 = arith.constant 0 : index
    %8 = vector.load %arg8[%c0_6, %c0_7] : memref<16x32xf32, #tpu.memory_space<vmem>>, vector<16x32xf32>
    tpu.vector_store %arg8[%c0_6, %c0_7], %7 {strides = array<i32>} : memref<16x32xf32, #tpu.memory_space<vmem>>, vector<16x32xf32>,
    %c0_i32_8 = arith.constant 0 : i32
    %9 = arith.cmpi eq, %arg2, %c0_i32_8 : i32
    %10 = arith.extui %9 : i1 to i32
    %c0_i32_9 = arith.constant 0 : i32
    %11 = arith.cmpi ne, %10, %c0_i32_9 : i32
    scf.if %11 {
      %c0_10 = arith.constant 0 : index
      %c0_11 = arith.constant 0 : index
      %12 = vector.load %arg8[%c0_10, %c0_11] : memref<16x32xf32, #tpu.memory_space<vmem>>, vector<16x32xf32>
      %c0_12 = arith.constant 0 : index
      %c0_13 = arith.constant 0 : index
      %13 = vector.load %arg7[%c0_12, %c0_13] : memref<16x32xf32, #tpu.memory_space<vmem>>, vector<16x32xf32>
      tpu.vector_store %arg7[%c0_12, %c0_13], %12 {strides = array<i32>} : memref<16x32xf32, #tpu.memory_space<vmem>>, vector<16x32xf32>,
    } else {
    }
    return
  }
  func.func @transform_0(%arg0: i32, %arg1: i32, %arg2: i32) -> (i32, i32) {
    %c0_i32 = arith.constant 0 : i32
    return %arg0, %arg2 : i32, i32
  }
  func.func @transform_1(%arg0: i32, %arg1: i32, %arg2: i32) -> (i32, i32) {
    %c0_i32 = arith.constant 0 : i32
    return %arg2, %arg1 : i32, i32
  }
  func.func @transform_2(%arg0: i32, %arg1: i32, %arg2: i32) -> (i32, i32) {
    %c0_i32 = arith.constant 0 : i32
    %c0_i32_0 = arith.constant 0 : i32
    return %c0_i32, %arg1 : i32, i32
  }
  func.func @transform_3(%arg0: i32, %arg1: i32, %arg2: i32) -> (i32, i32) {
    %c0_i32 = arith.constant 0 : i32
    return %arg0, %arg1 : i32, i32
  }
  func.func @transform_4(%arg0: i32, %arg1: i32, %arg2: i32) -> (i32, i32) {
    %c0_i32 = arith.constant 0 : i32
    return %arg0, %arg1 : i32, i32
  }
}

</mosaic_0001>

<bundles_post_ra>
// kernel: residual_add_linear.1
= control target key start
LH: loop header
LB: loop body
LE: loop exit
PB: predicated region body
PF: predicated region fallthrough
CT: control target
= control target key end

     0   :  { %9 = vsyncpa [#allocation4], 0  ;;  %s488_s0 = inlined_call_operand.hbm [shape: f32[16,32], index: 0, kind: input, shape index: {}, may-alias: {0,3}]   ;;  %s489_s1 = inlined_call_operand.hbm [shape: f32[32,32], index: 1, kind: input, shape index: {}]   ;;  %s490_s2 = inlined_call_operand.hbm [shape: f32[1,32], index: 2, kind: input, shape index: {}]   ;;  %s491_s3 = inlined_call_operand.hbm [shape: f32[16,32], index: 3, kind: input, shape index: {}, may-alias: {0,3}]   ;;  %s492_s4 = inlined_call_operand.hbm [shape: f32[16,32], index: 4, kind: output, shape index: {}]  }
   0x1   :  { %10 = vsyncpa [#allocation7], 0 }
   0x2   :  { %11 = vsyncpa [#allocation10], 0 }
   0x3   :  { %12 = vsyncpa [#allocation5], 0  ;;  %s362_s15 = smov [#allocation6]   ;;  %s363_s17 = smov [#allocation3]  }
   0x4   :  { %s30_s16 = sshll.u32 %s362_s15, 4  ;;  %s18_s18 = sshll.u32 %s363_s17, 4  ;;  %s31_s16 = int_to_ptr.vmem [resolvable:$true] %s30_s16  ;;  %s394_s18 = int_to_ptr.vmem [resolvable:$true] %s18_s18 }
   0x5   :  { %s244_s21 = scalar_lea.hbm %s489_s1, 512 }
   0x6   :  { %p245_p0 = scmp.ne.s32.totalorder %s489_s1, %s244_s21  ;;  %p248_p1 = scmp.lt.u32.totalorder %s244_s21, %s489_s1 }
   0x8   :  { %p250_p2 = pnand %p248_p1, %p245_p0 }
   0xa   :  { %253 = shalt.err (!%p250_p2)
}
   0xb   :  { %s254_s26 = scalar_lea.vmem %s31_s16, 512  ;;  %p259_p4 = scmp.lt.s32.totalorder %s31_s16, %s31_s16 }
   0xc   :  { %p255_p3 = scmp.ne.s32.totalorder %s31_s16, %s254_s26  ;;  %p260_p5 = scmp.lt.s32.totalorder %s254_s26, %s254_s26 }
   0xe   :  { %p261_p6 = por %p260_p5, %p259_p4 }
  0x10   :  { %p262_p7 = pnand %p261_p6, %p255_p3 }
  0x12   :  { %265 = shalt.err (!%p262_p7)
}
  0x13   :  { %s364_s27 = smov 128   ;;  %s365_s28 = smov 8  }
  0x14   :  { %36 = dma.hbm_to_vmem [thread:$0]  %s489_s1, 512, %s31_s16, [#allocation7], %s364_s27, %s364_s27, %s365_s28  }
  0x15   :  { %s266_s7 = scalar_lea.hbm %s488_s0, 256 }
  0x16   :  { %p267_p8 = scmp.ne.s32.totalorder %s488_s0, %s266_s7  ;;  %p270_p9 = scmp.lt.u32.totalorder %s266_s7, %s488_s0 }
  0x18   :  { %p272_p10 = pnand %p270_p9, %p267_p8 }
  0x1a   :  { %275 = shalt.err (!%p272_p10)
}
  0x1b   :  { %s276_s12 = scalar_lea.vmem %s394_s18, 256  ;;  %p281_p12 = scmp.lt.s32.totalorder %s394_s18, %s394_s18 }
  0x1c   :  { %p277_p11 = scmp.ne.s32.totalorder %s394_s18, %s276_s12  ;;  %p282_p13 = scmp.lt.s32.totalorder %s276_s12, %s276_s12 }
  0x1e   :  { %p283_p0 = por %p282_p13, %p281_p12 }
  0x20   :  { %p284_p1 = pnand %p283_p0, %p277_p11 }
  0x22   :  { %287 = shalt.err (!%p284_p1)
}
  0x23   :  { %24 = dma.hbm_to_vmem [thread:$0]  %s488_s0, 256, %s394_s18, [#allocation4], %s364_s27, %s364_s27, %s365_s28  }
  0x24   :  { %s366_s14 = smov [#allocation8]   ;;  %s367_s16 = smov [#allocation9]  }
  0x25   :  { %s43_s15 = sshll.u32 %s366_s14, 4  ;;  %s52_s17 = sshll.u32 %s367_s16, 4  ;;  %s44_s15 = int_to_ptr.vmem [resolvable:$true] %s43_s15  ;;  %s431_s17 = int_to_ptr.vmem [resolvable:$true] %s52_s17 }
  0x26   :  { %s288_s21 = scalar_lea.hbm %s490_s2, 16 }
  0x27   :  { %p289_p2 = scmp.ne.s32.totalorder %s490_s2, %s288_s21  ;;  %p292_p3 = scmp.lt.u32.totalorder %s288_s21, %s490_s2 }
  0x29   :  { %p294_p4 = pnand %p292_p3, %p289_p2 }
  0x2b   :  { %297 = shalt.err (!%p294_p4)
}
  0x2c   :  { %s298_s0 = scalar_lea.vmem %s44_s15, 16  ;;  %s302_s18 = scalar_lea.vmem %s44_s15, 32 }
  0x2d   :  { %p299_p5 = scmp.ne.s32.totalorder %s44_s15, %s298_s0  ;;  %p303_p6 = scmp.lt.s32.totalorder %s44_s15, %s44_s15 }
  0x2e   :  { %p304_p7 = scmp.lt.s32.totalorder %s302_s18, %s298_s0 }
  0x30   :  { %p305_p8 = por %p304_p7, %p303_p6 }
  0x32   :  { %p306_p9 = pnand %p305_p8, %p299_p5 }
  0x34   :  { %309 = shalt.err (!%p306_p9)
}
  0x35   :  { %46 = dma.hbm_to_vmem [thread:$0]  %s490_s2, 16, %s44_s15, [#allocation7]  }
  0x36   :  { %s310_s6 = scalar_lea.hbm %s491_s3, 256 }
  0x37   :  { %p311_p10 = scmp.ne.s32.totalorder %s491_s3, %s310_s6  ;;  %p314_p11 = scmp.lt.u32.totalorder %s310_s6, %s491_s3 }
  0x39   :  { %p316_p12 = pnand %p314_p11, %p311_p10 }
  0x3b   :  { %319 = shalt.err (!%p316_p12)
}
  0x3c   :  { %s320_s11 = scalar_lea.vmem %s431_s17, 256  ;;  %p325_p0 = scmp.lt.s32.totalorder %s431_s17, %s431_s17 }
  0x3d   :  { %p321_p13 = scmp.ne.s32.totalorder %s431_s17, %s320_s11  ;;  %p326_p1 = scmp.lt.s32.totalorder %s320_s11, %s320_s11 }
  0x3f   :  { %p327_p2 = por %p326_p1, %p325_p0 }
  0x41   :  { %p328_p3 = pnand %p327_p2, %p321_p13 }
  0x43   :  { %331 = shalt.err (!%p328_p3)
}
  0x44   :  { %58 = dma.hbm_to_vmem [thread:$0]  %s491_s3, 256, %s431_s17, [#allocation10], %s364_s27, %s364_s27, %s365_s28  }
  0x45   :  { %354 = dma.done.wait [#allocation4], 256  }
  0x46   :  { %355 = vsyncadd [#allocation4], 4294967040 }
  0x47   :  { %356 = dma.done.wait [#allocation7], 528  }
  0x48   :  { %357 = vsyncadd [#allocation7], 4294966768 }
  0x49   :  { %358 = dma.done.wait [#allocation10], 256  }
  0x4a   :  { %359 = vsyncadd [#allocation10], 4294967040  ;;  %vm86_vm0 = vcmask 261120   ;;  %v93_v0 = vld [vmem:[#allocation6] sm:$0xff]  ;;  %v94_v1 = vld [vmem:[#allocation6 + $0x8] sm:$0xff]  ;;  %s368_s3 = smov [#allocation11]  }
  0x4b   :  { %v95_v2 = vld [vmem:[#allocation6 + $0x10] sm:$0xff]  ;;  %v229_v3 = vpack.c.bf16 %v94_v1, %v93_v0  ;;  %v96_v4 = vld [vmem:[#allocation6 + $0x18] sm:$0xff]  ;;  %v209_v8 = vld [vmem:[#allocation8] ss:$0 sm:$0xff]  ;;  %s195_s1 = sshll.u32 %s368_s3, 4  ;;  %s196_s1 = int_to_ptr.vmem [resolvable:$true] %s195_s1 }
  0x4c   :  { %v91_v5 = vld [vmem:[#allocation3] sm:$0xff]  ;;  %v233_v6 = vpack.c.bf16 %v96_v4, %v95_v2  ;;  %v92_v10 = vld [vmem:[#allocation3 + $0x8] sm:$0xff]  ;;  %v75_v11 = vld [vmem:[#allocation9] sm:$0xff]  ;;  %s332_s13 = scalar_lea.vmem %s196_s1, 256  ;;  %p337_p5 = scmp.lt.s32.totalorder %s196_s1, %s196_s1 }
  0x4d   :  { %226 = vmatprep.mubr.msk.f32.mxu0 %vm86_vm0, %v91_v5  ;;  %v76_v7 = vld [vmem:[#allocation9 + $0x8] sm:$0xff]  ;;  %230 = vmatprep.subr.bf16.mxu0 %v229_v3  ;;  %v84_v12 = vadd.f32 %v209_v8, %v75_v11  ;;  %p333_p4 = scmp.ne.s32.totalorder %s196_s1, %s332_s13  ;;  %p338_p6 = scmp.lt.s32.totalorder %s332_s13, %s332_s13 }
  0x4e   :  { %v85_v9 = vadd.f32 %v209_v8, %v76_v7  ;;  %232 = vmatpush3.bf16.msra.mxu0 %v229_v3 }
  0x4f   :  { %234 = vmatprep.subr.bf16.mxu0 %v233_v6  ;;  %87 = vst.msk [vmem:[#allocation2] sm:$0xff] %vm86_vm0, %v84_v12  ;;  %p339_p7 = por %p338_p6, %p337_p5 }
  0x50   :  { %88 = vst.msk [vmem:[#allocation2 + $0x8] sm:$0xff] %vm86_vm0, %v85_v9 }
  0x51   :  { %p340_p8 = pnand %p339_p7, %p333_p4 }
  0x52   :  { %236 = vmatpush3.bf16.msra.mxu0 %v233_v6 }
  0x55   :  { %227 = vmatmul.mubr.msk.f32.vlgmr.msra.gmra.mrb[0].mxu0 %vm86_vm0, %v92_v10 }
  0x56   :  { %v89_v14 = vld [vmem:[#allocation2] sm:$0xff] }
  0x57   :  { %v90_v13 = vld [vmem:[#allocation2 + $0x8] sm:$0xff] }
 0x128   :  { %v228_v15 = vpop.f32.mrb[0].mxu0 }
 0x129   :  { %v180_v16 = vadd.f32 %v228_v15, %v90_v13  ;;  %v170_v17 = vpop.f32.mrb[1].mxu0 }
 0x12a   :  { %v179_v18 = vadd.f32 %v170_v17, %v89_v14 }
 0x12b   :  { %182 = vst.msk [vmem:[#allocation2 + $0x8] sm:$0xff] %vm86_vm0, %v180_v16 }
 0x12c   :  { %181 = vst.msk [vmem:[#allocation2] sm:$0xff] %vm86_vm0, %v179_v18 }
 0x132   :  { %v187_v19 = vld [vmem:[#allocation2 + $0x8] sm:$0xff] }
 0x133   :  { %v186_v20 = vld [vmem:[#allocation2] sm:$0xff]  ;;  %189 = vst.msk [vmem:[#allocation11 + $0x8] sm:$0xff] %vm86_vm0, %v187_v19 }
 0x134   :  { %188 = vst.msk [vmem:[#allocation11] sm:$0xff] %vm86_vm0, %v186_v20 }
 0x135   :  { %343 = shalt.err (!%p340_p8)
}
 0x136   :  { %s344_s16 = scalar_lea.hbm %s492_s4, 256 }
 0x137   :  { %p345_p9 = scmp.ne.s32.totalorder %s492_s4, %s344_s16  ;;  %p348_p10 = scmp.lt.u32.totalorder %s344_s16, %s492_s4 }
 0x139   :  { %p350_p11 = pnand %p348_p10, %p345_p9 }
 0x13b   :  { %353 = shalt.err (!%p350_p11)
}
 0x13c   :  { %201 = dma.vmem_to_hbm [thread:$0]  %s196_s1, 256, %s492_s4, [#allocation5], %s364_s27, %s364_s27, %s365_s28  }
 0x13d   :  { %360 = dma.done.wait [#allocation5], 256  }
 0x13e   :  { %361 = vsyncadd [#allocation5], 4294967040 }
 0x13f   :  { %205 = vsyncpa [#allocation4], 1 }
 0x140   :  { %206 = vsyncpa [#allocation7], 1 }
 0x141   :  { %207 = vsyncpa [#allocation10], 1 }
 0x142   :  { %208 = vsyncpa [#allocation5], 1 }

</bundles_post_ra>
